<compile_context>
chip_gen: v7x
topology: tpu7x:2x2x1
jax: 0.10.0
libtpu: 0.0.40
codegen_flags: <defaults>
</compile_context>

<pallas_src>
import functools

import jax
import jax.numpy as jnp
from jax.experimental import pallas as pl
from jax.experimental.pallas import tpu as pltpu


def _round_up(x, m):
    return (x + m - 1) // m * m


def _critic_kernel(s_ref, a_ref, w1s_ref, w1a_ref, b1_ref,
                   w2_ref, b2_ref, w3r_ref, b3_ref, o_ref, *, mxu_dtype):
    # Layer 1: concat fused via split W1 (two small-K MXU matmuls, f32 acc).
    # TODO(synk): could merge into a single K=16 matmul by stacking w1s/w1a and
    # assembling the 16-wide input in-kernel (minor; layer 1 is <5% of FLOPs).
    s = s_ref[...].astype(mxu_dtype)
    a = a_ref[...].astype(mxu_dtype)
    h1 = (jnp.dot(s, w1s_ref[...], preferred_element_type=jnp.float32)
          + jnp.dot(a, w1a_ref[...], preferred_element_type=jnp.float32)
          + b1_ref[...])
    h1 = jnp.maximum(h1, 0.0)

    # Layer 2: the MXU-bound core.  Operands in mxu_dtype (bf16 on the fast
    # path), f32 accumulation; bias/ReLU on the f32 accumulator.
    h2 = jnp.dot(h1.astype(mxu_dtype), w2_ref[...],
                 preferred_element_type=jnp.float32) + b2_ref[...]
    h2 = jnp.maximum(h2, 0.0)

    # Layer 3 (256 -> 1): VPU multiply + XLU lane reduction against the
    # pre-transposed (1, 256) w3 row, so only a (tile, 1) result hits HBM.
    q = jnp.sum(h2 * w3r_ref[...], axis=-1, keepdims=True) + b3_ref[...]
    o_ref[...] = q.astype(o_ref.dtype)


def prepare_critic_params(params, state_dim, *, use_bf16=True):
    """One-time weight preprocessing, hoisted out of the per-call path."""
    w1, b1, w2, b2, w3, b3 = params
    mxu_dtype = jnp.bfloat16 if use_bf16 else jnp.float32
    prepared = (
        jnp.asarray(w1[:state_dim], mxu_dtype),         # w1s  (sd, H)
        jnp.asarray(w1[state_dim:], mxu_dtype),         # w1a  (ad, H)
        jnp.asarray(b1, jnp.float32).reshape(1, -1),    # b1   (1, H)
        jnp.asarray(w2, mxu_dtype),                     # w2   (H, H)
        jnp.asarray(b2, jnp.float32).reshape(1, -1),    # b2   (1, H)
        jnp.asarray(w3, jnp.float32).reshape(1, -1),    # w3^T (1, H), stays f32
        jnp.asarray(b3, jnp.float32).reshape(1, 1),     # b3   (1, 1)
    )
    return prepared, mxu_dtype


def critic_forward(state, action, prepared, mxu_dtype=jnp.bfloat16, *, tb=1024):
    """Pallas forward pass. state: [B, state_dim], action: [B, action_dim]."""
    w1s, w1a, b1, w2, b2, w3r, b3 = prepared
    B, sd = state.shape
    ad = action.shape[1]
    H = w2.shape[0]

    # Batch tiling: largest tile up to `tb`, rounded to 8 so padding is at
    # most a few rows; keep >= 2 grid steps once the batch is big enough so
    # the "parallel" axis can use both v7x TensorCores.
    n_tiles = max(1, -(-B // tb))
    if n_tiles == 1 and B >= 512:
        n_tiles = 2
    tile = max(8, _round_up(-(-B // n_tiles), 8))
    Bp = tile * n_tiles
    if Bp != B:
        pad = Bp - B
        state = jnp.pad(state, ((0, pad), (0, 0)))
        action = jnp.pad(action, ((0, pad), (0, 0)))

    kernel = functools.partial(_critic_kernel, mxu_dtype=mxu_dtype)

    out = pl.pallas_call(
        kernel,
        out_shape=jax.ShapeDtypeStruct((Bp, 1), jnp.float32),
        grid_spec=pltpu.PrefetchScalarGridSpec(
            num_scalar_prefetch=0,
            grid=(n_tiles,),
            in_specs=[
                pl.BlockSpec((tile, sd), lambda i: (i, 0)),   # state tile
                pl.BlockSpec((tile, ad), lambda i: (i, 0)),   # action tile
                pl.BlockSpec((sd, H), lambda i: (0, 0)),      # W1[:sd] (resident)
                pl.BlockSpec((ad, H), lambda i: (0, 0)),      # W1[sd:] (resident)
                pl.BlockSpec((1, H), lambda i: (0, 0)),       # b1
                pl.BlockSpec((H, H), lambda i: (0, 0)),       # W2 (resident)
                pl.BlockSpec((1, H), lambda i: (0, 0)),       # b2
                pl.BlockSpec((1, H), lambda i: (0, 0)),       # w3^T row
                pl.BlockSpec((1, 1), lambda i: (0, 0)),       # b3
            ],
            out_specs=pl.BlockSpec((tile, 1), lambda i: (i, 0)),
        ),
        compiler_params=pltpu.CompilerParams(
            dimension_semantics=("parallel",),   # shard batch tiles over TCs (v7x)
        ),
    )(state, action, w1s, w1a, b1, w2, b2, w3r, b3)

    return out if Bp == B else out[:B]


def init_critic_params(key, state_dim, action_dim, hidden=256):
    """Deterministic PyTorch-Linear-style init: U(-1/sqrt(fan_in), 1/sqrt(fan_in))."""
    d_in = state_dim + action_dim
    ks = jax.random.split(key, 6)

    def lin(kw, kb, fan_in, fan_out):
        bound = 1.0 / jnp.sqrt(jnp.float32(fan_in))
        w = jax.random.uniform(kw, (fan_in, fan_out), jnp.float32, -bound, bound)
        b = jax.random.uniform(kb, (1, fan_out), jnp.float32, -bound, bound)
        return w, b

    w1, b1 = lin(ks[0], ks[1], d_in, hidden)
    w2, b2 = lin(ks[2], ks[3], hidden, hidden)
    w3, b3 = lin(ks[4], ks[5], hidden, 1)
    return (w1, b1, w2, b2, w3, b3)


def critic_ref(state, action, params):
    w1, b1, w2, b2, w3, b3 = params
    x = jnp.concatenate([state, action], axis=1)
    h1 = jnp.maximum(x @ w1 + b1, 0.0)
    h2 = jnp.maximum(h1 @ w2 + b2, 0.0)
    return h2 @ w3 + b3


if __name__ == "__main__":
    key = jax.random.PRNGKey(0)
    k_p, k_s, k_a, k_s2, k_a2 = jax.random.split(key, 5)

    state_dim, action_dim = 12, 4
    params = init_critic_params(k_p, state_dim, action_dim)

    # One-time weight prep (hoisted out of the forward path).
    prep_bf16, dt_bf16 = prepare_critic_params(params, state_dim, use_bf16=True)
    prep_f32, dt_f32 = prepare_critic_params(params, state_dim, use_bf16=False)

    # Small batch: single grid step.
    batch = 8
    state = jax.random.normal(k_s, (batch, state_dim), jnp.float32)
    action = jax.random.normal(k_a, (batch, action_dim), jnp.float32)
    q_ref = critic_ref(state, action, params)

    q_f32 = jax.block_until_ready(critic_forward(state, action, prep_f32, dt_f32))
    assert q_f32.shape == (batch, 1), q_f32.shape
    assert jnp.allclose(q_f32, q_ref, atol=1e-4, rtol=1e-4), (q_f32, q_ref)

    q_bf16 = jax.block_until_ready(critic_forward(state, action, prep_bf16, dt_bf16))
    assert q_bf16.shape == (batch, 1), q_bf16.shape
    assert jnp.allclose(q_bf16, q_ref, atol=2e-2, rtol=2e-2), (q_bf16, q_ref)

    # Non-multiple batch: exercises small adaptive padding + multi-step grid.
    batch2 = 260
    state2 = jax.random.normal(k_s2, (batch2, state_dim), jnp.float32)
    action2 = jax.random.normal(k_a2, (batch2, action_dim), jnp.float32)
    q2_ref = critic_ref(state2, action2, params)

    q2_f32 = jax.block_until_ready(critic_forward(state2, action2, prep_f32, dt_f32))
    assert q2_f32.shape == (batch2, 1), q2_f32.shape
    assert jnp.allclose(q2_f32, q2_ref, atol=1e-4, rtol=1e-4), (q2_f32, q2_ref)

    # Force a 3-step grid to exercise the multi-tile "parallel" path.
    q2_bf16 = jax.block_until_ready(
        critic_forward(state2, action2, prep_bf16, dt_bf16, tb=128))
    assert q2_bf16.shape == (batch2, 1), q2_bf16.shape
    assert jnp.allclose(q2_bf16, q2_ref, atol=2e-2, rtol=2e-2), (q2_bf16, q2_ref)

    print("KERNEL_OK")
</pallas_src>

<mosaic_0001>
module attributes {stable_mosaic.version = 11 : i64} {
  func.func @_critic_kernel(%arg0: i32, %arg1: memref<8x12xf32, #tpu.memory_space<vmem>>, %arg2: memref<8x4xf32, #tpu.memory_space<vmem>>, %arg3: memref<12x256xf32, #tpu.memory_space<vmem>>, %arg4: memref<4x256xf32, #tpu.memory_space<vmem>>, %arg5: memref<1x256xf32, #tpu.memory_space<vmem>>, %arg6: memref<256x256xf32, #tpu.memory_space<vmem>>, %arg7: memref<1x256xf32, #tpu.memory_space<vmem>>, %arg8: memref<1x256xf32, #tpu.memory_space<vmem>>, %arg9: memref<1x1xf32, #tpu.memory_space<vmem>>, %arg10: memref<8x1xf32, #tpu.memory_space<vmem>>) attributes {dimension_semantics = [#tpu.dimension_semantics<parallel>], iteration_bounds = array<i64: 1>, scalar_prefetch = 0 : i64, scratch_operands = 0 : i64, tpu.core_type = #tpu.core_type<tc>, window_params = [{transform_indices = @transform_0, window_bounds = array<i64: 8, 12>}, {transform_indices = @transform_1, window_bounds = array<i64: 8, 4>}, {pipeline_mode = #tpu.pipeline_mode<synchronous>, transform_indices = @transform_2, window_bounds = array<i64: 12, 256>}, {pipeline_mode = #tpu.pipeline_mode<synchronous>, transform_indices = @transform_3, window_bounds = array<i64: 4, 256>}, {pipeline_mode = #tpu.pipeline_mode<synchronous>, transform_indices = @transform_4, window_bounds = array<i64: 1, 256>}, {pipeline_mode = #tpu.pipeline_mode<synchronous>, transform_indices = @transform_5, window_bounds = array<i64: 256, 256>}, {pipeline_mode = #tpu.pipeline_mode<synchronous>, transform_indices = @transform_6, window_bounds = array<i64: 1, 256>}, {pipeline_mode = #tpu.pipeline_mode<synchronous>, transform_indices = @transform_7, window_bounds = array<i64: 1, 256>}, {pipeline_mode = #tpu.pipeline_mode<synchronous>, transform_indices = @transform_8, window_bounds = array<i64: 1, 1>}, {transform_indices = @transform_9, window_bounds = array<i64: 8, 1>}]} {
    %c0 = arith.constant 0 : index
    %c0_0 = arith.constant 0 : index
    %0 = vector.load %arg1[%c0, %c0_0] : memref<8x12xf32, #tpu.memory_space<vmem>>, vector<8x12xf32>
    %c0_1 = arith.constant 0 : index
    %c0_2 = arith.constant 0 : index
    %1 = vector.load %arg2[%c0_1, %c0_2] : memref<8x4xf32, #tpu.memory_space<vmem>>, vector<8x4xf32>
    %c0_3 = arith.constant 0 : index
    %c0_4 = arith.constant 0 : index
    %2 = vector.load %arg3[%c0_3, %c0_4] : memref<12x256xf32, #tpu.memory_space<vmem>>, vector<12x256xf32>
    %cst = arith.constant dense<0.000000e+00> : vector<8x256xf32>
    %3 = tpu.matmul %0, %2, %cst {dimension_numbers = #tpu.dot_dimension_numbers<[1], [0], [0], [1], [0, 0, 1, 1], [], []>} : vector<8x12xf32>, vector<12x256xf32>, vector<8x256xf32> -> vector<8x256xf32>
    %c0_5 = arith.constant 0 : index
    %c0_6 = arith.constant 0 : index
    %4 = vector.load %arg4[%c0_5, %c0_6] : memref<4x256xf32, #tpu.memory_space<vmem>>, vector<4x256xf32>
    %cst_7 = arith.constant dense<0.000000e+00> : vector<8x256xf32>
    %5 = tpu.matmul %1, %4, %cst_7 {dimension_numbers = #tpu.dot_dimension_numbers<[1], [0], [0], [1], [0, 0, 1, 1], [], []>} : vector<8x4xf32>, vector<4x256xf32>, vector<8x256xf32> -> vector<8x256xf32>
    %6 = arith.addf %3, %5 : vector<8x256xf32>
    %c0_8 = arith.constant 0 : index
    %c0_9 = arith.constant 0 : index
    %7 = vector.load %arg5[%c0_8, %c0_9] : memref<1x256xf32, #tpu.memory_space<vmem>>, vector<1x256xf32>
    %8 = vector.broadcast %7 : vector<1x256xf32> to vector<8x256xf32>
    %9 = arith.addf %6, %8 : vector<8x256xf32>
    %cst_10 = arith.constant 0.000000e+00 : f32
    %10 = vector.broadcast %cst_10 : f32 to vector<8x256xf32>
    %11 = arith.maximumf %9, %10 : vector<8x256xf32>
    %c0_11 = arith.constant 0 : index
    %c0_12 = arith.constant 0 : index
    %12 = vector.load %arg6[%c0_11, %c0_12] : memref<256x256xf32, #tpu.memory_space<vmem>>, vector<256x256xf32>
    %cst_13 = arith.constant dense<0.000000e+00> : vector<8x256xf32>
    %13 = tpu.matmul %11, %12, %cst_13 {dimension_numbers = #tpu.dot_dimension_numbers<[1], [0], [0], [1], [0, 0, 1, 1], [], []>} : vector<8x256xf32>, vector<256x256xf32>, vector<8x256xf32> -> vector<8x256xf32>
    %c0_14 = arith.constant 0 : index
    %c0_15 = arith.constant 0 : index
    %14 = vector.load %arg7[%c0_14, %c0_15] : memref<1x256xf32, #tpu.memory_space<vmem>>, vector<1x256xf32>
    %15 = vector.broadcast %14 : vector<1x256xf32> to vector<8x256xf32>
    %16 = arith.addf %13, %15 : vector<8x256xf32>
    %cst_16 = arith.constant 0.000000e+00 : f32
    %17 = vector.broadcast %cst_16 : f32 to vector<8x256xf32>
    %18 = arith.maximumf %16, %17 : vector<8x256xf32>
    %c0_17 = arith.constant 0 : index
    %c0_18 = arith.constant 0 : index
    %19 = vector.load %arg8[%c0_17, %c0_18] : memref<1x256xf32, #tpu.memory_space<vmem>>, vector<1x256xf32>
    %20 = vector.broadcast %19 : vector<1x256xf32> to vector<8x256xf32>
    %21 = arith.mulf %18, %20 : vector<8x256xf32>
    %cst_19 = arith.constant dense<0.000000e+00> : vector<8xf32>
    %22 = vector.multi_reduction <add>, %21, %cst_19 [1] : vector<8x256xf32> to vector<8xf32>
    %23 = vector.shape_cast %22 : vector<8xf32> to vector<8x1xf32>
    %c0_20 = arith.constant 0 : index
    %c0_21 = arith.constant 0 : index
    %24 = vector.load %arg9[%c0_20, %c0_21] : memref<1x1xf32, #tpu.memory_space<vmem>>, vector<1x1xf32>
    %25 = vector.broadcast %24 : vector<1x1xf32> to vector<8x1xf32>
    %26 = arith.addf %23, %25 : vector<8x1xf32>
    %c0_22 = arith.constant 0 : index
    %c0_23 = arith.constant 0 : index
    %27 = vector.load %arg10[%c0_22, %c0_23] : memref<8x1xf32, #tpu.memory_space<vmem>>, vector<8x1xf32>
    tpu.vector_store %arg10[%c0_22, %c0_23], %26 {strides = array<i32>} : memref<8x1xf32, #tpu.memory_space<vmem>>, vector<8x1xf32>,
    return
  }
  func.func @transform_0(%arg0: i32) -> (i32, i32) {
    %c0_i32 = arith.constant 0 : i32
    %c0_i32_0 = arith.constant 0 : i32
    return %arg0, %c0_i32 : i32, i32
  }
  func.func @transform_1(%arg0: i32) -> (i32, i32) {
    %c0_i32 = arith.constant 0 : i32
    %c0_i32_0 = arith.constant 0 : i32
    return %arg0, %c0_i32 : i32, i32
  }
  func.func @transform_2(%arg0: i32) -> (i32, i32) {
    %c0_i32 = arith.constant 0 : i32
    %c0_i32_0 = arith.constant 0 : i32
    %c0_i32_1 = arith.constant 0 : i32
    return %c0_i32, %c0_i32_0 : i32, i32
  }
  func.func @transform_3(%arg0: i32) -> (i32, i32) {
    %c0_i32 = arith.constant 0 : i32
    %c0_i32_0 = arith.constant 0 : i32
    %c0_i32_1 = arith.constant 0 : i32
    return %c0_i32, %c0_i32_0 : i32, i32
  }
  func.func @transform_4(%arg0: i32) -> (i32, i32) {
    %c0_i32 = arith.constant 0 : i32
    %c0_i32_0 = arith.constant 0 : i32
    %c0_i32_1 = arith.constant 0 : i32
    return %c0_i32, %c0_i32_0 : i32, i32
  }
  func.func @transform_5(%arg0: i32) -> (i32, i32) {
    %c0_i32 = arith.constant 0 : i32
    %c0_i32_0 = arith.constant 0 : i32
    %c0_i32_1 = arith.constant 0 : i32
    return %c0_i32, %c0_i32_0 : i32, i32
  }
  func.func @transform_6(%arg0: i32) -> (i32, i32) {
    %c0_i32 = arith.constant 0 : i32
    %c0_i32_0 = arith.constant 0 : i32
    %c0_i32_1 = arith.constant 0 : i32
    return %c0_i32, %c0_i32_0 : i32, i32
  }
  func.func @transform_7(%arg0: i32) -> (i32, i32) {
    %c0_i32 = arith.constant 0 : i32
    %c0_i32_0 = arith.constant 0 : i32
    %c0_i32_1 = arith.constant 0 : i32
    return %c0_i32, %c0_i32_0 : i32, i32
  }
  func.func @transform_8(%arg0: i32) -> (i32, i32) {
    %c0_i32 = arith.constant 0 : i32
    %c0_i32_0 = arith.constant 0 : i32
    %c0_i32_1 = arith.constant 0 : i32
    return %c0_i32, %c0_i32_0 : i32, i32
  }
  func.func @transform_9(%arg0: i32) -> (i32, i32) {
    %c0_i32 = arith.constant 0 : i32
    %c0_i32_0 = arith.constant 0 : i32
    return %arg0, %c0_i32 : i32, i32
  }
}

</mosaic_0001>

<bundles_post_ra>
// kernel: tpu_custom_call.1
= control target key start
LH: loop header
LB: loop body
LE: loop exit
PB: predicated region body
PF: predicated region fallthrough
CT: control target
= control target key end

     0   :  { %s679_s0 = inlined_call_operand.vmem [shape: f32[8,12], index: 0, kind: input, shape index: {}]   ;;  %s680_s1 = inlined_call_operand.vmem [shape: f32[8,4], index: 1, kind: input, shape index: {}]   ;;  %s681_s2 = inlined_call_operand.hbm [shape: f32[12,256], index: 2, kind: input, shape index: {}]   ;;  %s682_s3 = inlined_call_operand.vmem [shape: f32[4,256], index: 3, kind: input, shape index: {}]   ;;  %s683_s4 = inlined_call_operand.vmem [shape: f32[1,256], index: 4, kind: input, shape index: {}]   ;;  %s684_s5 = inlined_call_operand.hbm [shape: f32[256,256], index: 5, kind: input, shape index: {}]   ;;  %s685_s6 = inlined_call_operand.vmem [shape: f32[1,256], index: 6, kind: input, shape index: {}]   ;;  %s686_s7 = inlined_call_operand.vmem [shape: f32[1,256], index: 7, kind: input, shape index: {}]   ;;  %s687_s8 = inlined_call_operand.<no memory space> [shape: f32[1,1], index: 8, kind: input, shape index: {}]   ;;  %s688_s9 = inlined_call_operand.vmem [shape: f32[8,1], index: 9, kind: output, shape index: {}]  }
   0x1   :  { %v14_v0 = vstv %s687_s8 }
   0x2   :  { %15 = vst [vmem:[#allocation2] sm:$0x1] %v14_v0 }
   0x3   :  { %16 = vsyncpa [#allocation4], 0 }
   0x4   :  { %17 = vsyncpa [#allocation6], 0  ;;  %s564_s11 = smov [#allocation3]   ;;  %s516_s15 = scalar_lea.hbm %s681_s2, 512 }
   0x5   :  { %s27_s12 = sshll.u32 %s564_s11, 4  ;;  %p517_p0 = scmp.ne.s32.totalorder %s681_s2, %s516_s15  ;;  %s28_s12 = int_to_ptr.vmem [resolvable:$true] %s27_s12 }
   0x6   :  { %p520_p1 = scmp.lt.u32.totalorder %s516_s15, %s681_s2 }
   0x8   :  { %p522_p2 = pnand %p520_p1, %p517_p0 }
   0xa   :  { %525 = shalt.err (!%p522_p2)
}
   0xb   :  { %s526_s8 = scalar_lea.vmem %s28_s12, 512  ;;  %p531_p4 = scmp.lt.s32.totalorder %s28_s12, %s28_s12 }
   0xc   :  { %p527_p3 = scmp.ne.s32.totalorder %s28_s12, %s526_s8  ;;  %p532_p5 = scmp.lt.s32.totalorder %s526_s8, %s526_s8 }
   0xe   :  { %p533_p6 = por %p532_p5, %p531_p4 }
  0x10   :  { %p534_p7 = pnand %p533_p6, %p527_p3 }
  0x12   :  { %537 = shalt.err (!%p534_p7)
}
  0x13   :  { %s565_s20 = smov 256   ;;  %s566_s21 = smov 16  }
  0x14   :  { %33 = dma.hbm_to_vmem [thread:$0]  %s681_s2, 512, %s28_s12, [#allocation4], %s565_s20, %s565_s20, %s566_s21  }
  0x15   :  { %s567_s24 = smov [#allocation5]   ;;  %s538_s28 = scalar_lea.hbm %s684_s5, 8192 }
  0x16   :  { %s43_s25 = sshll.u32 %s567_s24, 4  ;;  %p539_p8 = scmp.ne.s32.totalorder %s684_s5, %s538_s28  ;;  %s44_s25 = int_to_ptr.vmem [resolvable:$true] %s43_s25 }
  0x17   :  { %p542_p9 = scmp.lt.u32.totalorder %s538_s28, %s684_s5 }
  0x19   :  { %p544_p10 = pnand %p542_p9, %p539_p8 }
  0x1b   :  { %547 = shalt.err (!%p544_p10)
}
  0x1c   :  { %s548_s13 = scalar_lea.vmem %s44_s25, 8192  ;;  %p553_p12 = scmp.lt.s32.totalorder %s44_s25, %s44_s25 }
  0x1d   :  { %p549_p11 = scmp.ne.s32.totalorder %s44_s25, %s548_s13  ;;  %p554_p13 = scmp.lt.s32.totalorder %s548_s13, %s548_s13 }
  0x1f   :  { %p555_p0 = por %p554_p13, %p553_p12 }
  0x21   :  { %p556_p1 = pnand %p555_p0, %p549_p11 }
  0x23   :  { %559 = shalt.err (!%p556_p1)
}
  0x24   :  { %49 = dma.hbm_to_vmem [thread:$0]  %s684_s5, 8192, %s44_s25, [#allocation6], %s565_s20, %s565_s20, %s566_s21  }
  0x25   :  { %560 = dma.done.wait [#allocation4], 512  }
  0x26   :  { %561 = vsyncadd [#allocation4], 4294966784 }
  0x27   :  { %562 = dma.done.wait [#allocation6], 8192  }
  0x28   :  { %563 = vsyncadd [#allocation6], 4294959104  ;;  %v568_v1 = vmov 0.0   ;;  %vm75_vm0 = vcmask 1043456   ;;  %v68_v2 = vld [vmem:[%s682_s3] sm:$0xff]  ;;  %v65_v3 = vld [vmem:[#allocation3 + $0x8] sm:$0xff] }
  0x29   :  { %144 = vmatprep.mubr.f32.mxu0 %v568_v1  ;;  %vm569_vm1 = vmmov 1   ;;  %v70_v5 = vcombine.high %v68_v2, %v68_v2  ;;  %v67_v6 = vld [vmem:[#allocation3 + $0x18] sm:$0xf]  ;;  %v64_v7 = vld [vmem:[#allocation3] sm:$0xff]  ;;  %v66_v8 = vld [vmem:[#allocation3 + $0x10] sm:$0xf] }
  0x2a   :  { %vm651_vm2 = vmpackc.low %vm75_vm0, %vm569_vm1  ;;  %v63_v9 = vld [vmem:[%s680_s1] sm:$0xff]  ;;  %vm71_vm3 = vcmask 31744   ;;  %v437_v10 = vpack.c.bf16 %v67_v6, %v65_v3  ;;  %v440_v11 = vpack.c.bf16 %v66_v8, %v64_v7  ;;  %v249_v12 = vld [vmem:[#allocation5 + $0x8] sm:$0xff]  ;;  %vm151_vm4 = vcmask 97280  }
  0x2b   :  { %v251_v13 = vld [vmem:[#allocation5 + $0x18] sm:$0xff]  ;;  %430 = vmatprep.subr.msk.mxu0 %vm75_vm0, %v70_v5  ;;  %v248_v15 = vld [vmem:[#allocation5] sm:$0xff]  ;;  %v250_v16 = vld [vmem:[#allocation5 + $0x10] sm:$0xff]  ;;  %vm422_vm5 = vcmask 7168  }
  0x2c   :  { %v443_v14 = vpack.c.bf16 %v251_v13, %v249_v12  ;;  %v253_v17 = vld [vmem:[#allocation5 + $0x28] sm:$0xff]  ;;  %431 = vmatpush1.msk.msra.mxu0 %vm75_vm0, %v68_v2  ;;  %v445_v18 = vpack.c.bf16 %v250_v16, %v248_v15  ;;  %v255_v19 = vld [vmem:[#allocation5 + $0x38] sm:$0xff]  ;;  %v252_v21 = vld [vmem:[#allocation5 + $0x20] sm:$0xff] }
  0x2d   :  { %432 = vmatmul.mubr.msk.f32.vlgmr.msra.gmra.mrb[0].mxu0 %vm71_vm3, %v63_v9  ;;  %439 = vmatprep.subr.msk.bf16.mxu0 %vm651_vm2, %v437_v10  ;;  %v447_v20 = vpack.c.bf16 %v255_v19, %v253_v17  ;;  %v254_v22 = vld [vmem:[#allocation5 + $0x30] sm:$0xff]  ;;  %v257_v23 = vld [vmem:[#allocation5 + $0x48] sm:$0xff]  ;;  %v259_v24 = vld [vmem:[#allocation5 + $0x58] sm:$0xff] }
  0x2e   :  { %442 = vmatpush1.bf16.msk.msra.mxu0 %vm651_vm2, %v440_v11  ;;  %225 = vmatprep.mubr.f32.mxu0 %v568_v1  ;;  %v449_v25 = vpack.c.bf16 %v254_v22, %v252_v21  ;;  %v451_v26 = vpack.c.bf16 %v259_v24, %v257_v23  ;;  %v256_v27 = vld [vmem:[#allocation5 + $0x40] sm:$0xff]  ;;  %v258_v28 = vld [vmem:[#allocation5 + $0x50] sm:$0xff]  ;;  %v261_v30 = vld [vmem:[#allocation5 + $0x68] sm:$0xff] }
  0x2f   :  { %444 = vmatprep.subr.bf16.mxu1 %v443_v14  ;;  %v62_v29 = vld [vmem:[%s679_s0] sm:$0xff]  ;;  %v453_v32 = vpack.c.bf16 %v258_v28, %v256_v27  ;;  %v262_v35 = vld [vmem:[#allocation5 + $0x70] sm:$0xff]  ;;  %v265_v36 = vld [vmem:[#allocation5 + $0x88] sm:$0xff] }
  0x30   :  { %446 = vmatpush1.bf16.msra.mxu1 %v445_v18  ;;  %v263_v31 = vld [vmem:[#allocation5 + $0x78] sm:$0xff]  ;;  %v260_v34 = vld [vmem:[#allocation5 + $0x60] sm:$0xff]  ;;  %v266_v41 = vld [vmem:[#allocation5 + $0x90] sm:$0xff] }
  0x31   :  { %448 = vmatprep.subr.bf16.mxu1 %v447_v20  ;;  %v455_v33 = vpack.c.bf16 %v263_v31, %v261_v30  ;;  %v267_v37 = vld [vmem:[#allocation5 + $0x98] sm:$0xff]  ;;  %v457_v38 = vpack.c.bf16 %v262_v35, %v260_v34  ;;  %v264_v40 = vld [vmem:[#allocation5 + $0x80] sm:$0xff]  ;;  %v269_v42 = vld [vmem:[#allocation5 + $0xa8] sm:$0xff] }
  0x32   :  { %v459_v39 = vpack.c.bf16 %v267_v37, %v265_v36  ;;  %v271_v43 = vld [vmem:[#allocation5 + $0xb8] sm:$0xff]  ;;  %v461_v44 = vpack.c.bf16 %v266_v41, %v264_v40  ;;  %v268_v46 = vld [vmem:[#allocation5 + $0xa0] sm:$0xff]  ;;  %v270_v47 = vld [vmem:[#allocation5 + $0xb0] sm:$0xff] }
  0x33   :  { %v463_v45 = vpack.c.bf16 %v271_v43, %v269_v42  ;;  %v273_v48 = vld [vmem:[#allocation5 + $0xc8] sm:$0xff]  ;;  %v275_v49 = vld [vmem:[#allocation5 + $0xd8] sm:$0xff]  ;;  %v465_v50 = vpack.c.bf16 %v270_v47, %v268_v46  ;;  %v272_v52 = vld [vmem:[#allocation5 + $0xc0] sm:$0xff] }
  0x34   :  { %450 = vmatpush1.bf16.msra.mxu1 %v449_v25  ;;  %v467_v51 = vpack.c.bf16 %v275_v49, %v273_v48  ;;  %v274_v53 = vld [vmem:[#allocation5 + $0xd0] sm:$0xff]  ;;  %v277_v54 = vld [vmem:[#allocation5 + $0xe8] sm:$0xff]  ;;  %v279_v55 = vld [vmem:[#allocation5 + $0xf8] sm:$0xff] }
  0x35   :  { %435 = vmatmul.mubr.msk.f32.vlgmr.msra.gmra.mrb[0].mxu0 %vm151_vm4, %v62_v29  ;;  %452 = vmatprep.subr.bf16.mxu1 %v451_v26  ;;  %v469_v56 = vpack.c.bf16 %v274_v53, %v272_v52  ;;  %v471_v57 = vpack.c.bf16 %v279_v55, %v277_v54  ;;  %v276_v58 = vld [vmem:[#allocation5 + $0xe0] sm:$0xff]  ;;  %v278_v59 = vld [vmem:[#allocation5 + $0xf0] sm:$0xff]  ;;  %v281_v60 = vld [vmem:[#allocation5 + $0x108] sm:$0xff] }
  0x36   :  { %v283_v61 = vld [vmem:[#allocation5 + $0x118] sm:$0xff]  ;;  %v473_v62 = vpack.c.bf16 %v278_v59, %v276_v58  ;;  %v280_v0 = vld [vmem:[#allocation5 + $0x100] sm:$0xff]  ;;  %v282_v1 = vld [vmem:[#allocation5 + $0x110] sm:$0xff] }
  0x37   :  { %v475_v63 = vpack.c.bf16 %v283_v61, %v281_v60  ;;  %v285_v2 = vld [vmem:[#allocation5 + $0x128] sm:$0xff]  ;;  %v287_v3 = vld [vmem:[#allocation5 + $0x138] sm:$0xff]  ;;  %v477_v4 = vpack.c.bf16 %v282_v1, %v280_v0  ;;  %v284_v6 = vld [vmem:[#allocation5 + $0x120] sm:$0xff] }
  0x38   :  { %454 = vmatpush1.bf16.msra.mxu1 %v453_v32  ;;  %v479_v5 = vpack.c.bf16 %v287_v3, %v285_v2  ;;  %v286_v7 = vld [vmem:[#allocation5 + $0x130] sm:$0xff]  ;;  %v289_v8 = vld [vmem:[#allocation5 + $0x148] sm:$0xff]  ;;  %v291_v9 = vld [vmem:[#allocation5 + $0x158] sm:$0xff] }
  0x39   :  { %456 = vmatprep.subr.bf16.mxu1 %v455_v33  ;;  %v481_v10 = vpack.c.bf16 %v286_v7, %v284_v6  ;;  %v483_v11 = vpack.c.bf16 %v291_v9, %v289_v8  ;;  %v288_v12 = vld [vmem:[#allocation5 + $0x140] sm:$0xff]  ;;  %v290_v13 = vld [vmem:[#allocation5 + $0x150] sm:$0xff]  ;;  %v293_v14 = vld [vmem:[#allocation5 + $0x168] sm:$0xff] }
  0x3a   :  { %v295_v15 = vld [vmem:[#allocation5 + $0x178] sm:$0xff]  ;;  %v485_v16 = vpack.c.bf16 %v290_v13, %v288_v12  ;;  %v292_v18 = vld [vmem:[#allocation5 + $0x160] sm:$0xff]  ;;  %v294_v19 = vld [vmem:[#allocation5 + $0x170] sm:$0xff] }
  0x3b   :  { %v487_v17 = vpack.c.bf16 %v295_v15, %v293_v14  ;;  %v297_v20 = vld [vmem:[#allocation5 + $0x188] sm:$0xff]  ;;  %v299_v21 = vld [vmem:[#allocation5 + $0x198] sm:$0xff]  ;;  %v489_v22 = vpack.c.bf16 %v294_v19, %v292_v18  ;;  %v296_v24 = vld [vmem:[#allocation5 + $0x180] sm:$0xff] }
  0x3c   :  { %458 = vmatpush1.bf16.msra.mxu1 %v457_v38  ;;  %v491_v23 = vpack.c.bf16 %v299_v21, %v297_v20  ;;  %v298_v25 = vld [vmem:[#allocation5 + $0x190] sm:$0xff]  ;;  %v301_v26 = vld [vmem:[#allocation5 + $0x1a8] sm:$0xff]  ;;  %v303_v27 = vld [vmem:[#allocation5 + $0x1b8] sm:$0xff] }
  0x3d   :  { %460 = vmatprep.subr.bf16.mxu1 %v459_v39  ;;  %v493_v28 = vpack.c.bf16 %v298_v25, %v296_v24  ;;  %v495_v29 = vpack.c.bf16 %v303_v27, %v301_v26  ;;  %v300_v30 = vld [vmem:[#allocation5 + $0x1a0] sm:$0xff]  ;;  %v302_v31 = vld [vmem:[#allocation5 + $0x1b0] sm:$0xff]  ;;  %v305_v32 = vld [vmem:[#allocation5 + $0x1c8] sm:$0xff] }
  0x3e   :  { %v307_v33 = vld [vmem:[#allocation5 + $0x1d8] sm:$0xff]  ;;  %v497_v34 = vpack.c.bf16 %v302_v31, %v300_v30  ;;  %v304_v36 = vld [vmem:[#allocation5 + $0x1c0] sm:$0xff]  ;;  %v306_v37 = vld [vmem:[#allocation5 + $0x1d0] sm:$0xff] }
  0x3f   :  { %v499_v35 = vpack.c.bf16 %v307_v33, %v305_v32  ;;  %v501_v38 = vpack.c.bf16 %v306_v37, %v304_v36  ;;  %v309_v39 = vld [vmem:[#allocation5 + $0x1e8] sm:$0xff]  ;;  %v311_v40 = vld [vmem:[#allocation5 + $0x1f8] sm:$0xff]  ;;  %v308_v42 = vld [vmem:[#allocation5 + $0x1e0] sm:$0xff] }
  0x40   :  { %462 = vmatpush1.bf16.msra.mxu1 %v461_v44  ;;  %v503_v41 = vpack.c.bf16 %v311_v40, %v309_v39  ;;  %v310_v43 = vld [vmem:[#allocation5 + $0x1f0] sm:$0xff]  ;;  %v232_v48 = vld [vmem:[%s683_s4] sm:$0x3] }
  0x41   :  { %464 = vmatprep.subr.bf16.mxu1 %v463_v45  ;;  %v505_v44 = vpack.c.bf16 %v310_v43, %v308_v42  ;;  %v234_v45 = vlaneseq  ;;  %v312_v58 = vld [vmem:[%s685_s6] sm:$0x3] }
  0x42   :  { %v397_v61 = vld [vmem:[%s686_s7] sm:$0x3] }
  0x43   :  { %v235_v46 = vshrl.u32 %v234_v45, 7  ;;  %v436_v9 = vld [vmem:[#allocation2] ss:$0 sm:$0xff] }
  0x44   :  { %466 = vmatpush1.bf16.msra.mxu1 %v465_v50 }
  0x45   :  { %468 = vmatprep.subr.bf16.mxu1 %v467_v51  ;;  %v236_v47 = vsub.s32 0, %v235_v46  ;;  %v240_v49 = vsub.s32 1, %v235_v46 }
  0x47   :  { %v237_v50 = vrot.slane %v232_v48, %v236_v47  ;;  %v241_v51 = vrot.slane %v232_v48, %v240_v49  ;;  %v317_v59 = vrot.slane %v312_v58, %v236_v47  ;;  %v321_v60 = vrot.slane %v312_v58, %v240_v49 }
  0x48   :  { %470 = vmatpush1.bf16.msra.mxu1 %v469_v56  ;;  %v402_v1 = vrot.slane %v397_v61, %v236_v47  ;;  %v406_v3 = vrot.slane %v397_v61, %v240_v49 }
  0x49   :  { %472 = vmatprep.subr.bf16.mxu1 %v471_v57 }
  0x4c   :  { %474 = vmatpush1.bf16.msra.mxu1 %v473_v62 }
  0x4d   :  { %476 = vmatprep.subr.bf16.mxu1 %v475_v63 }
  0x50   :  { %478 = vmatpush1.bf16.msra.mxu1 %v477_v4 }
  0x51   :  { %480 = vmatprep.subr.bf16.mxu1 %v479_v5 }
  0x54   :  { %482 = vmatpush1.bf16.msra.mxu1 %v481_v10 }
  0x55   :  { %484 = vmatprep.subr.bf16.mxu1 %v483_v11 }
  0x58   :  { %486 = vmatpush1.bf16.msra.mxu1 %v485_v16 }
  0x59   :  { %488 = vmatprep.subr.bf16.mxu1 %v487_v17 }
  0x5c   :  { %490 = vmatpush1.bf16.msra.mxu1 %v489_v22 }
  0x5d   :  { %492 = vmatprep.subr.bf16.mxu1 %v491_v23 }
  0x60   :  { %494 = vmatpush1.bf16.msra.mxu1 %v493_v28 }
  0x61   :  { %496 = vmatprep.subr.bf16.mxu1 %v495_v29 }
  0x64   :  { %498 = vmatpush1.bf16.msra.mxu1 %v497_v34 }
  0x65   :  { %500 = vmatprep.subr.bf16.mxu1 %v499_v35 }
  0x68   :  { %502 = vmatpush1.bf16.msra.mxu1 %v501_v38 }
  0x69   :  { %504 = vmatprep.subr.bf16.mxu1 %v503_v41 }
  0x6c   :  { %506 = vmatpush1.bf16.msra.mxu1 %v505_v44 }
 0x108   :  { %v227_v52 = vpop.f32.mrb[0].mxu0 }
 0x109   :  { %v244_v53 = vadd.f32 %v237_v50, %v227_v52  ;;  %v229_v54 = vpop.f32.mrb[1].mxu0 }
 0x10a   :  { %v245_v55 = vadd.f32 %v241_v51, %v229_v54 }
 0x10b   :  { %v246_v57 = vmax.f32 %v244_v53, 0.0 }
 0x10c   :  { %v247_v56 = vmax.f32 %v245_v55, 0.0 }
 0x10e   :  { %388 = vmatprep.mubr.f32.mxu1 %v247_v56 }
 0x10f   :  { %389 = vmatmul.mubr.f32.vlgmr.msra.gmra.mrb[0].mxu1 %v246_v57 }
 0x1e2   :  { %v390_v62 = vpop.f32.mrb[0].mxu1 }
 0x1e3   :  { %v391_v63 = vadd.f32 %v390_v62, %v317_v59  ;;  %v392_v0 = vpop.f32.mrb[1].mxu1 }
 0x1e4   :  { %v393_v2 = vadd.f32 %v392_v0, %v321_v60 }
 0x1e5   :  { %v395_v4 = vmax.f32 %v391_v63, 0.0 }
 0x1e6   :  { %v396_v5 = vmax.f32 %v393_v2, 0.0 }
 0x1e7   :  { %v409_v6 = vmul.f32 %v402_v1, %v395_v4 }
 0x1e8   :  { %v410_v7 = vmul.f32 %v406_v3, %v396_v5 }
 0x1ea   :  { %v411_v8 = vadd.f32 %v410_v7, %v409_v6 }
 0x1ec   :  { %412 = vadd.xlane.f32.xlu0 %v411_v8 }
 0x279   :  { %v413_v10 = vpop.xlane.xlu0 %412 }
 0x27a   :  { %v421_v11 = vadd.f32 %v436_v9, %v413_v10 }
 0x27c   :  { %423 = vst.msk [vmem:[%s688_s9] sm:$0xff] %vm422_vm5, %v421_v11 }
 0x27d   :  { %428 = vsyncpa [#allocation4], 1 }
 0x27e   :  { %429 = vsyncpa [#allocation6], 1 }

</bundles_post_ra>
